<compile_context>
chip_gen: v6e
topology: v6e:2x2x1
jax: 0.10.0
libtpu: 0.0.40
codegen_flags: <defaults>
</compile_context>

<pallas_src>
import functools

import jax
import jax.numpy as jnp
from jax.experimental import pallas as pl
from jax.experimental.pallas import tpu as pltpu

LN_EPS = 1e-5  # PyTorch nn.LayerNorm default


def _round_up(a, m):
    return -(-a // m) * m


# ---------------------------------------------------------------------------
# Kernel: fused MLP (+ optional LayerNorm) on one batch tile
# ---------------------------------------------------------------------------
def _mlp_kernel(x_ref, w0_ref, wstack_ref, vec_ref, out_ref, *,
                n_linear, use_layernorm):
    """vec_ref rows: [b_0, ..., b_{n-1}, ln_gamma, ln_beta], shape (n+2, L)."""
    # First layer: (tile_b, d_in) @ (d_in, L); bf16 MXU inputs, f32 accumulate.
    h = jnp.dot(x_ref[...].astype(jnp.bfloat16), w0_ref[...],
                preferred_element_type=jnp.float32)
    h = h + vec_ref[0:1, :]
    if n_linear > 1:
        h = jnp.maximum(h, 0.0)                       # ReLU on hidden layer

    # Remaining layers use the stacked (L, L) weights; static unroll.
    for l in range(1, n_linear):
        h = jnp.dot(h.astype(jnp.bfloat16), wstack_ref[l - 1],
                    preferred_element_type=jnp.float32)
        h = h + vec_ref[l:l + 1, :]
        if l < n_linear - 1:                          # no ReLU on final Linear
            h = jnp.maximum(h, 0.0)

    if use_layernorm:
        # One-pass statistics: var = E[x^2] - mean^2 (single XLU sweep each).
        inv_n = 1.0 / h.shape[-1]
        s = jnp.sum(h, axis=-1, keepdims=True)
        ss = jnp.sum(h * h, axis=-1, keepdims=True)
        mean = s * inv_n
        var = ss * inv_n - mean * mean
        h = (h - mean) * jax.lax.rsqrt(var + LN_EPS)
        h = (h * vec_ref[n_linear:n_linear + 1, :]
             + vec_ref[n_linear + 1:n_linear + 2, :])

    out_ref[...] = h.astype(out_ref.dtype)


# ---------------------------------------------------------------------------
# VMEM working-set estimate (bytes) for a given batch tile
# ---------------------------------------------------------------------------
def _vmem_bytes(tile_b, d_in, latent, n_stack, n_linear, w_bytes, x_bytes,
                out_bytes, single_buffer_weights):
    wf = 1 if single_buffer_weights else 2
    weights = wf * (d_in * latent + n_stack * latent * latent) * w_bytes
    vecs = wf * (n_linear + 2) * latent * 4
    x_tile = 2 * tile_b * d_in * x_bytes          # double-buffered input tile
    o_tile = 2 * tile_b * latent * out_bytes      # double-buffered output tile
    live = 3 * tile_b * latent * 4                # live f32 h + bf16 copy + slack
    return weights + vecs + x_tile + o_tile + live


# ---------------------------------------------------------------------------
# Wrapper
# ---------------------------------------------------------------------------
def custom_mlp_forward(x, w0, w_stack, vec_params, use_layernorm, *,
                       tile_b=512, out_dtype=None):
    """x: (B, d_in); w0: (d_in, L) bf16; w_stack: (n-1, L, L) bf16;
    vec_params: (n+2, L) f32  ->  (B, L)."""
    B, d_in = x.shape
    n_stack = w_stack.shape[0]
    n_linear = n_stack + 1
    latent = w_stack.shape[-1]
    out_dtype = x.dtype if out_dtype is None else jnp.dtype(out_dtype)

    # --- batch tiling: big tiles by default, never exceed (padded) batch ----
    tile_b = max(8, min(int(tile_b), _round_up(B, 8)))
    tile_b = _round_up(tile_b, 8)

    # Shrink tile_b until the working set fits a budget that is safe on all
    # generations (v7x has only 64 MiB physical VMEM).
    budget = 40 << 20
    w_b = jnp.dtype(w0.dtype).itemsize
    x_b = jnp.dtype(x.dtype).itemsize
    est = _vmem_bytes(tile_b, d_in, latent, n_stack, n_linear, w_b, x_b,
                      out_dtype.itemsize, True)
    while tile_b > 8 and est > budget:
        tile_b = _round_up(tile_b // 2, 8)
        est = _vmem_bytes(tile_b, d_in, latent, n_stack, n_linear, w_b, x_b,
                          out_dtype.itemsize, True)

    b_pad = _round_up(B, tile_b)
    x_p = x if b_pad == B else jnp.pad(x, ((0, b_pad - B), (0, 0)))
    grid = (b_pad // tile_b,)

    # Explicit scoped-VMEM limit (v5e default is only 16 MiB of 128 MiB).
    vmem_limit = int(min(max(2 * est, 32 << 20), 48 << 20))

    kernel = functools.partial(_mlp_kernel, n_linear=n_linear,
                               use_layernorm=use_layernorm)

    def build(single_buffer_weights):
        def const_spec(shape):
            idx = lambda i, _s=shape: (0,) * len(_s)
            if single_buffer_weights:
                # Grid-invariant operand: fetched once, no double buffering.
                return pl.BlockSpec(shape, idx, pipeline_mode=pl.Buffered(1))
            return pl.BlockSpec(shape, idx)

        return pl.pallas_call(
            kernel,
            out_shape=jax.ShapeDtypeStruct((b_pad, latent), out_dtype),
            grid=grid,
            in_specs=[
                pl.BlockSpec((tile_b, d_in), lambda i: (i, 0)),   # x batch tile
                const_spec(w0.shape),                             # (d_in, L)
                const_spec(w_stack.shape),                        # (n-1, L, L)
                const_spec(vec_params.shape),                     # (n+2, L)
            ],
            out_specs=pl.BlockSpec((tile_b, latent), lambda i: (i, 0)),
            compiler_params=pltpu.CompilerParams(
                dimension_semantics=("parallel",),   # shard batch tiles (v7x)
                vmem_limit_bytes=vmem_limit),
        )

    try:
        out = jax.block_until_ready(build(True)(x_p, w0, w_stack, vec_params))
    except Exception:
        # Fallback for JAX versions without BlockSpec pipeline_mode support:
        # identical semantics, default double-buffered constants.
        out = build(False)(x_p, w0, w_stack, vec_params)

    return out if b_pad == B else out[:B]


# ---------------------------------------------------------------------------
# Deterministic parameter construction (PyTorch nn.Linear default init)
# ---------------------------------------------------------------------------
def make_custom_mlp_params(key, input_size, latent_size, mlp_num_hidden_layers):
    n_linear = mlp_num_hidden_layers + 1           # hidden layers + final Linear
    keys = jax.random.split(key, 2 * n_linear)
    weights, biases = [], []
    in_dim = input_size
    for i in range(n_linear):
        bound = 1.0 / (in_dim ** 0.5)
        w = jax.random.uniform(keys[2 * i], (in_dim, latent_size),
                               minval=-bound, maxval=bound, dtype=jnp.float32)
        b = jax.random.uniform(keys[2 * i + 1], (latent_size,),
                               minval=-bound, maxval=bound, dtype=jnp.float32)
        weights.append(w)
        biases.append(b)
        in_dim = latent_size
    # bf16 weights: first layer separate, all (L, L) layers stacked.
    w0 = weights[0].astype(jnp.bfloat16)
    w_stack = jnp.stack(weights[1:], axis=0).astype(jnp.bfloat16)
    # biases + LayerNorm gamma/beta packed into a single (n+2, L) f32 array.
    vec_params = jnp.stack(
        biases + [jnp.ones((latent_size,), jnp.float32),
                  jnp.zeros((latent_size,), jnp.float32)], axis=0)
    return w0, w_stack, vec_params


# ---------------------------------------------------------------------------
# Pure-JAX reference (same parameters, f32 math; mirrors PyTorch semantics)
# ---------------------------------------------------------------------------
def custom_mlp_ref(x, w0, w_stack, vec_params, use_layernorm):
    n_linear = w_stack.shape[0] + 1
    ws = [w0.astype(jnp.float32)] + [w_stack[i].astype(jnp.float32)
                                     for i in range(w_stack.shape[0])]
    h = x.astype(jnp.float32)
    for l in range(n_linear):
        h = h @ ws[l] + vec_params[l]
        if l < n_linear - 1:
            h = jnp.maximum(h, 0.0)
    if use_layernorm:
        mean = h.mean(-1, keepdims=True)
        var = ((h - mean) ** 2).mean(-1, keepdims=True)
        h = (h - mean) / jnp.sqrt(var + LN_EPS)
        h = h * vec_params[n_linear] + vec_params[n_linear + 1]
    return h


# ---------------------------------------------------------------------------
if __name__ == "__main__":
    batch = 64                   # small demo; real workloads use tile_b=512
    input_size = 64
    latent_size = 128            # lane-dense feature dim (full 128-lane vregs)
    mlp_num_hidden_layers = 2

    key = jax.random.PRNGKey(0)
    k_x, k_p1, k_p2 = jax.random.split(key, 3)

    x = jax.random.normal(k_x, (batch, input_size), dtype=jnp.float32)

    ok = True
    for use_ln, k_p in ((False, k_p1), (True, k_p2)):
        w0, w_stack, vec_params = make_custom_mlp_params(
            k_p, input_size, latent_size, mlp_num_hidden_layers)

        out = custom_mlp_forward(x, w0, w_stack, vec_params, use_ln)
        out = jax.block_until_ready(out)

        ref = custom_mlp_ref(x, w0, w_stack, vec_params, use_ln)
        ref = jax.block_until_ready(ref)

        # tolerance covers bf16 MXU inputs with f32 accumulation
        if not jnp.allclose(out, ref, atol=2e-2, rtol=2e-2):
            ok = False
            print(f"MISMATCH (layernorm={use_ln}): "
                  f"max abs err = {float(jnp.max(jnp.abs(out - ref)))}")

    assert ok, "Custom_mlp Pallas output mismatch vs reference"
    print("KERNEL_OK")
</pallas_src>

<mosaic_0001>
module attributes {stable_mosaic.version = 11 : i64} {
  func.func @_mlp_kernel(%arg0: i32, %arg1: memref<64x64xf32, #tpu.memory_space<vmem>>, %arg2: memref<64x128xbf16, #tpu.memory_space<vmem>>, %arg3: memref<2x128x128xbf16, #tpu.memory_space<vmem>>, %arg4: memref<5x128xf32, #tpu.memory_space<vmem>>, %arg5: memref<64x128xf32, #tpu.memory_space<vmem>>) attributes {dimension_semantics = [#tpu.dimension_semantics<parallel>], iteration_bounds = array<i64: 1>, scalar_prefetch = 0 : i64, scratch_operands = 0 : i64, tpu.core_type = #tpu.core_type<tc>, window_params = [{transform_indices = @transform_0, window_bounds = array<i64: 64, 64>}, {pipeline_mode = #tpu.pipeline_mode<synchronous>, transform_indices = @transform_1, window_bounds = array<i64: 64, 128>}, {pipeline_mode = #tpu.pipeline_mode<synchronous>, transform_indices = @transform_2, window_bounds = array<i64: 2, 128, 128>}, {pipeline_mode = #tpu.pipeline_mode<synchronous>, transform_indices = @transform_3, window_bounds = array<i64: 5, 128>}, {transform_indices = @transform_4, window_bounds = array<i64: 64, 128>}]} {
    %c0 = arith.constant 0 : index
    %c0_0 = arith.constant 0 : index
    %0 = vector.load %arg1[%c0, %c0_0] : memref<64x64xf32, #tpu.memory_space<vmem>>, vector<64x64xf32>
    %1 = arith.truncf %0 : vector<64x64xf32> to vector<64x64xbf16>
    %c0_1 = arith.constant 0 : index
    %c0_2 = arith.constant 0 : index
    %2 = vector.load %arg2[%c0_1, %c0_2] : memref<64x128xbf16, #tpu.memory_space<vmem>>, vector<64x128xbf16>
    %cst = arith.constant dense<0.000000e+00> : vector<64x128xf32>
    %3 = tpu.matmul %1, %2, %cst {dimension_numbers = #tpu.dot_dimension_numbers<[1], [0], [0], [1], [0, 0, 1, 1], [], []>} : vector<64x64xbf16>, vector<64x128xbf16>, vector<64x128xf32> -> vector<64x128xf32>
    %c0_3 = arith.constant 0 : index
    %c0_4 = arith.constant 0 : index
    %4 = vector.load %arg4[%c0_3, %c0_4] : memref<5x128xf32, #tpu.memory_space<vmem>>, vector<1x128xf32>
    %5 = vector.broadcast %4 : vector<1x128xf32> to vector<64x128xf32>
    %6 = arith.addf %3, %5 : vector<64x128xf32>
    %cst_5 = arith.constant 0.000000e+00 : f32
    %7 = vector.broadcast %cst_5 : f32 to vector<64x128xf32>
    %8 = arith.maximumf %6, %7 : vector<64x128xf32>
    %9 = arith.truncf %8 : vector<64x128xf32> to vector<64x128xbf16>
    %c0_6 = arith.constant 0 : index
    %c0_7 = arith.constant 0 : index
    %c0_8 = arith.constant 0 : index
    %10 = vector.load %arg3[%c0_6, %c0_7, %c0_8] : memref<2x128x128xbf16, #tpu.memory_space<vmem>>, vector<1x128x128xbf16>
    %11 = vector.shape_cast %10 : vector<1x128x128xbf16> to vector<128x128xbf16>
    %cst_9 = arith.constant dense<0.000000e+00> : vector<64x128xf32>
    %12 = tpu.matmul %9, %11, %cst_9 {dimension_numbers = #tpu.dot_dimension_numbers<[1], [0], [0], [1], [0, 0, 1, 1], [], []>} : vector<64x128xbf16>, vector<128x128xbf16>, vector<64x128xf32> -> vector<64x128xf32>
    %c1 = arith.constant 1 : index
    %c0_10 = arith.constant 0 : index
    %13 = vector.load %arg4[%c1, %c0_10] : memref<5x128xf32, #tpu.memory_space<vmem>>, vector<1x128xf32>
    %14 = vector.broadcast %13 : vector<1x128xf32> to vector<64x128xf32>
    %15 = arith.addf %12, %14 : vector<64x128xf32>
    %cst_11 = arith.constant 0.000000e+00 : f32
    %16 = vector.broadcast %cst_11 : f32 to vector<64x128xf32>
    %17 = arith.maximumf %15, %16 : vector<64x128xf32>
    %18 = arith.truncf %17 : vector<64x128xf32> to vector<64x128xbf16>
    %c1_12 = arith.constant 1 : index
    %c0_13 = arith.constant 0 : index
    %c0_14 = arith.constant 0 : index
    %19 = vector.load %arg3[%c1_12, %c0_13, %c0_14] : memref<2x128x128xbf16, #tpu.memory_space<vmem>>, vector<1x128x128xbf16>
    %20 = vector.shape_cast %19 : vector<1x128x128xbf16> to vector<128x128xbf16>
    %cst_15 = arith.constant dense<0.000000e+00> : vector<64x128xf32>
    %21 = tpu.matmul %18, %20, %cst_15 {dimension_numbers = #tpu.dot_dimension_numbers<[1], [0], [0], [1], [0, 0, 1, 1], [], []>} : vector<64x128xbf16>, vector<128x128xbf16>, vector<64x128xf32> -> vector<64x128xf32>
    %c2 = arith.constant 2 : index
    %c0_16 = arith.constant 0 : index
    %22 = vector.load %arg4[%c2, %c0_16] : memref<5x128xf32, #tpu.memory_space<vmem>>, vector<1x128xf32>
    %23 = vector.broadcast %22 : vector<1x128xf32> to vector<64x128xf32>
    %24 = arith.addf %21, %23 : vector<64x128xf32>
    %c0_17 = arith.constant 0 : index
    %c0_18 = arith.constant 0 : index
    %25 = vector.load %arg5[%c0_17, %c0_18] : memref<64x128xf32, #tpu.memory_space<vmem>>, vector<64x128xf32>
    tpu.vector_store %arg5[%c0_17, %c0_18], %24 {strides = array<i32>} : memref<64x128xf32, #tpu.memory_space<vmem>>, vector<64x128xf32>,
    return
  }
  func.func @transform_0(%arg0: i32) -> (i32, i32) {
    %c0_i32 = arith.constant 0 : i32
    %c0_i32_0 = arith.constant 0 : i32
    return %arg0, %c0_i32 : i32, i32
  }
  func.func @transform_1(%arg0: i32) -> (i32, i32) {
    %c0_i32 = arith.constant 0 : i32
    %c0_i32_0 = arith.constant 0 : i32
    %c0_i32_1 = arith.constant 0 : i32
    return %c0_i32, %c0_i32_0 : i32, i32
  }
  func.func @transform_2(%arg0: i32) -> (i32, i32, i32) {
    %c0_i32 = arith.constant 0 : i32
    %c0_i32_0 = arith.constant 0 : i32
    %c0_i32_1 = arith.constant 0 : i32
    %c0_i32_2 = arith.constant 0 : i32
    return %c0_i32, %c0_i32_0, %c0_i32_1 : i32, i32, i32
  }
  func.func @transform_3(%arg0: i32) -> (i32, i32) {
    %c0_i32 = arith.constant 0 : i32
    %c0_i32_0 = arith.constant 0 : i32
    %c0_i32_1 = arith.constant 0 : i32
    return %c0_i32, %c0_i32_0 : i32, i32
  }
  func.func @transform_4(%arg0: i32) -> (i32, i32) {
    %c0_i32 = arith.constant 0 : i32
    %c0_i32_0 = arith.constant 0 : i32
    return %arg0, %c0_i32 : i32, i32
  }
}

module attributes {stable_mosaic.version = 11 : i64} {
  func.func @_mlp_kernel(%arg0: i32, %arg1: memref<64x64xf32, #tpu.memory_space<vmem>>, %arg2: memref<64x128xbf16, #tpu.memory_space<vmem>>, %arg3: memref<2x128x128xbf16, #tpu.memory_space<vmem>>, %arg4: memref<5x128xf32, #tpu.memory_space<vmem>>, %arg5: memref<64x128xf32, #tpu.memory_space<vmem>>) attributes {dimension_semantics = [#tpu.dimension_semantics<parallel>], iteration_bounds = array<i64: 1>, scalar_prefetch = 0 : i64, scratch_operands = 0 : i64, tpu.core_type = #tpu.core_type<tc>, window_params = [{transform_indices = @transform_0, window_bounds = array<i64: 64, 64>}, {pipeline_mode = #tpu.pipeline_mode<synchronous>, transform_indices = @transform_1, window_bounds = array<i64: 64, 128>}, {pipeline_mode = #tpu.pipeline_mode<synchronous>, transform_indices = @transform_2, window_bounds = array<i64: 2, 128, 128>}, {pipeline_mode = #tpu.pipeline_mode<synchronous>, transform_indices = @transform_3, window_bounds = array<i64: 5, 128>}, {transform_indices = @transform_4, window_bounds = array<i64: 64, 128>}]} {
    %c0 = arith.constant 0 : index
    %c0_0 = arith.constant 0 : index
    %0 = vector.load %arg1[%c0, %c0_0] : memref<64x64xf32, #tpu.memory_space<vmem>>, vector<64x64xf32>
    %1 = arith.truncf %0 : vector<64x64xf32> to vector<64x64xbf16>
    %c0_1 = arith.constant 0 : index
    %c0_2 = arith.constant 0 : index
    %2 = vector.load %arg2[%c0_1, %c0_2] : memref<64x128xbf16, #tpu.memory_space<vmem>>, vector<64x128xbf16>
    %cst = arith.constant dense<0.000000e+00> : vector<64x128xf32>
    %3 = tpu.matmul %1, %2, %cst {dimension_numbers = #tpu.dot_dimension_numbers<[1], [0], [0], [1], [0, 0, 1, 1], [], []>} : vector<64x64xbf16>, vector<64x128xbf16>, vector<64x128xf32> -> vector<64x128xf32>
    %c0_3 = arith.constant 0 : index
    %c0_4 = arith.constant 0 : index
    %4 = vector.load %arg4[%c0_3, %c0_4] : memref<5x128xf32, #tpu.memory_space<vmem>>, vector<1x128xf32>
    %5 = vector.broadcast %4 : vector<1x128xf32> to vector<64x128xf32>
    %6 = arith.addf %3, %5 : vector<64x128xf32>
    %cst_5 = arith.constant 0.000000e+00 : f32
    %7 = vector.broadcast %cst_5 : f32 to vector<64x128xf32>
    %8 = arith.maximumf %6, %7 : vector<64x128xf32>
    %9 = arith.truncf %8 : vector<64x128xf32> to vector<64x128xbf16>
    %c0_6 = arith.constant 0 : index
    %c0_7 = arith.constant 0 : index
    %c0_8 = arith.constant 0 : index
    %10 = vector.load %arg3[%c0_6, %c0_7, %c0_8] : memref<2x128x128xbf16, #tpu.memory_space<vmem>>, vector<1x128x128xbf16>
    %11 = vector.shape_cast %10 : vector<1x128x128xbf16> to vector<128x128xbf16>
    %cst_9 = arith.constant dense<0.000000e+00> : vector<64x128xf32>
    %12 = tpu.matmul %9, %11, %cst_9 {dimension_numbers = #tpu.dot_dimension_numbers<[1], [0], [0], [1], [0, 0, 1, 1], [], []>} : vector<64x128xbf16>, vector<128x128xbf16>, vector<64x128xf32> -> vector<64x128xf32>
    %c1 = arith.constant 1 : index
    %c0_10 = arith.constant 0 : index
    %13 = vector.load %arg4[%c1, %c0_10] : memref<5x128xf32, #tpu.memory_space<vmem>>, vector<1x128xf32>
    %14 = vector.broadcast %13 : vector<1x128xf32> to vector<64x128xf32>
    %15 = arith.addf %12, %14 : vector<64x128xf32>
    %cst_11 = arith.constant 0.000000e+00 : f32
    %16 = vector.broadcast %cst_11 : f32 to vector<64x128xf32>
    %17 = arith.maximumf %15, %16 : vector<64x128xf32>
    %18 = arith.truncf %17 : vector<64x128xf32> to vector<64x128xbf16>
    %c1_12 = arith.constant 1 : index
    %c0_13 = arith.constant 0 : index
    %c0_14 = arith.constant 0 : index
    %19 = vector.load %arg3[%c1_12, %c0_13, %c0_14] : memref<2x128x128xbf16, #tpu.memory_space<vmem>>, vector<1x128x128xbf16>
    %20 = vector.shape_cast %19 : vector<1x128x128xbf16> to vector<128x128xbf16>
    %cst_15 = arith.constant dense<0.000000e+00> : vector<64x128xf32>
    %21 = tpu.matmul %18, %20, %cst_15 {dimension_numbers = #tpu.dot_dimension_numbers<[1], [0], [0], [1], [0, 0, 1, 1], [], []>} : vector<64x128xbf16>, vector<128x128xbf16>, vector<64x128xf32> -> vector<64x128xf32>
    %c2 = arith.constant 2 : index
    %c0_16 = arith.constant 0 : index
    %22 = vector.load %arg4[%c2, %c0_16] : memref<5x128xf32, #tpu.memory_space<vmem>>, vector<1x128xf32>
    %23 = vector.broadcast %22 : vector<1x128xf32> to vector<64x128xf32>
    %24 = arith.addf %21, %23 : vector<64x128xf32>
    %c0_17 = arith.constant 0 : index
    %c0_18 = arith.constant 0 : index
    %25 = vector.load %arg5[%c0_17, %c0_18] : memref<64x128xf32, #tpu.memory_space<vmem>>, vector<64x128xf32>
    tpu.vector_store %arg5[%c0_17, %c0_18], %24 {strides = array<i32>} : memref<64x128xf32, #tpu.memory_space<vmem>>, vector<64x128xf32>,
    return
  }
  func.func @transform_0(%arg0: i32) -> (i32, i32) {
    %c0_i32 = arith.constant 0 : i32
    %c0_i32_0 = arith.constant 0 : i32
    return %arg0, %c0_i32 : i32, i32
  }
  func.func @transform_1(%arg0: i32) -> (i32, i32) {
    %c0_i32 = arith.constant 0 : i32
    %c0_i32_0 = arith.constant 0 : i32
    %c0_i32_1 = arith.constant 0 : i32
    return %c0_i32, %c0_i32_0 : i32, i32
  }
  func.func @transform_2(%arg0: i32) -> (i32, i32, i32) {
    %c0_i32 = arith.constant 0 : i32
    %c0_i32_0 = arith.constant 0 : i32
    %c0_i32_1 = arith.constant 0 : i32
    %c0_i32_2 = arith.constant 0 : i32
    return %c0_i32, %c0_i32_0, %c0_i32_1 : i32, i32, i32
  }
  func.func @transform_3(%arg0: i32) -> (i32, i32) {
    %c0_i32 = arith.constant 0 : i32
    %c0_i32_0 = arith.constant 0 : i32
    %c0_i32_1 = arith.constant 0 : i32
    return %c0_i32, %c0_i32_0 : i32, i32
  }
  func.func @transform_4(%arg0: i32) -> (i32, i32) {
    %c0_i32 = arith.constant 0 : i32
    %c0_i32_0 = arith.constant 0 : i32
    return %arg0, %c0_i32 : i32, i32
  }
}

</mosaic_0001>

<bundles_post_ra>
// kernel: tpu_custom_call.1
= control target key start
LH: loop header
LB: loop body
LE: loop exit
PB: predicated region body
PF: predicated region fallthrough
CT: control target
= control target key end

     0   :  { %9 = vsyncpa [#allocation3], 0  ;;  %s844_s0 = inlined_call_operand.hbm [shape: f32[64,64], index: 0, kind: input, shape index: {}]   ;;  %s845_s1 = inlined_call_operand.hbm [shape: bf16[64,128], index: 1, kind: input, shape index: {}]   ;;  %s846_s2 = inlined_call_operand.hbm [shape: bf16[2,128,128], index: 2, kind: input, shape index: {}]   ;;  %s847_s3 = inlined_call_operand.hbm [shape: f32[5,128], index: 3, kind: input, shape index: {}]   ;;  %s848_s4 = inlined_call_operand.hbm [shape: f32[64,128], index: 4, kind: output, shape index: {}]  }
   0x1   :  { %10 = vsyncpa [#allocation6], 0 }
   0x2   :  { %11 = vsyncpa [#allocation9], 0 }
   0x3   :  { %12 = vsyncpa [#allocation4], 0  ;;  %s779_s15 = smov [#allocation5]  }
   0x4   :  { %s30_s16 = sshll.u32 %s779_s15, 4  ;;  %s31_s16 = int_to_ptr.vmem [resolvable:$true] %s30_s16 }
   0x5   :  { %s679_s17 = scalar_lea.vmem %s31_s16, 512  ;;  %p684_p1 = scmp.lt.s32.totalorder %s31_s16, %s31_s16 }
   0x6   :  { %p680_p0 = scmp.ne.s32.totalorder %s31_s16, %s679_s17  ;;  %p685_p2 = scmp.lt.s32.totalorder %s679_s17, %s679_s17 }
   0x8   :  { %p686_p3 = por %p685_p2, %p684_p1 }
   0xa   :  { %p687_p4 = pnand %p686_p3, %p680_p0 }
   0xc   :  { %690 = shalt.err (!%p687_p4)
}
   0xd   :  { %s780_s18 = smov 64   ;;  %s781_s19 = smov 4  }
   0xe   :  { %36 = dma.hbm_to_vmem [thread:$0]  %s845_s1, 512, %s31_s16, [#allocation6], %s780_s18, %s780_s18, %s781_s19  }
   0xf   :  { %s782_s22 = smov [#allocation2]  }
  0x10   :  { %s18_s23 = sshll.u32 %s782_s22, 4  ;;  %s19_s23 = int_to_ptr.vmem [resolvable:$true] %s18_s23 }
  0x11   :  { %s699_s24 = scalar_lea.vmem %s19_s23, 1024  ;;  %p704_p6 = scmp.lt.s32.totalorder %s19_s23, %s19_s23 }
  0x12   :  { %p700_p5 = scmp.ne.s32.totalorder %s19_s23, %s699_s24  ;;  %p705_p7 = scmp.lt.s32.totalorder %s699_s24, %s699_s24 }
  0x14   :  { %p706_p8 = por %p705_p7, %p704_p6 }
  0x16   :  { %p707_p9 = pnand %p706_p8, %p700_p5 }
  0x18   :  { %710 = shalt.err (!%p707_p9)
}
  0x19   :  { %s783_s25 = smov 128   ;;  %s784_s26 = smov 8  }
  0x1a   :  { %24 = dma.hbm_to_vmem [thread:$0]  %s844_s0, 1024, %s19_s23, [#allocation3], %s783_s25, %s783_s25, %s784_s26  }
  0x1b   :  { %s785_s1 = smov [#allocation7]   ;;  %s786_s30 = smov [#allocation8]  }
  0x1c   :  { %s42_s29 = sshll.u32 %s785_s1, 4  ;;  %s55_s5 = sshll.u32 %s786_s30, 4  ;;  %s43_s29 = int_to_ptr.vmem [resolvable:$true] %s42_s29  ;;  %s56_s5 = int_to_ptr.vmem [resolvable:$true] %s55_s5 }
  0x1d   :  { %s719_s6 = scalar_lea.vmem %s43_s29, 2048  ;;  %p724_p11 = scmp.lt.s32.totalorder %s43_s29, %s43_s29 }
  0x1e   :  { %p720_p10 = scmp.ne.s32.totalorder %s43_s29, %s719_s6  ;;  %p725_p12 = scmp.lt.s32.totalorder %s719_s6, %s719_s6 }
  0x20   :  { %p726_p13 = por %p725_p12, %p724_p11 }
  0x22   :  { %p727_p0 = pnand %p726_p13, %p720_p10 }
  0x24   :  { %730 = shalt.err (!%p727_p0)
}
  0x25   :  { %48 = dma.hbm_to_vmem [thread:$0]  %s846_s2, 2048, %s43_s29, [#allocation6], %s780_s18, %s780_s18, %s781_s19  }
  0x26   :  { %s739_s0 = scalar_lea.vmem %s56_s5, 128  ;;  %p744_p2 = scmp.lt.s32.totalorder %s56_s5, %s56_s5 }
  0x27   :  { %p740_p1 = scmp.ne.s32.totalorder %s56_s5, %s739_s0  ;;  %p745_p3 = scmp.lt.s32.totalorder %s739_s0, %s739_s0 }
  0x29   :  { %p746_p4 = por %p745_p3, %p744_p2 }
  0x2b   :  { %p747_p5 = pnand %p746_p4, %p740_p1 }
  0x2d   :  { %750 = shalt.err (!%p747_p5)
}
  0x2e   :  { %58 = dma.hbm_to_vmem [thread:$0]  %s847_s3, 128, %s56_s5, [#allocation9]  }
  0x2f   :  { %771 = dma.done.wait [#allocation3], 1024  }
  0x30   :  { %772 = vsyncadd [#allocation3], 4294966272 }
  0x31   :  { %773 = dma.done.wait [#allocation6], 2560  }
  0x32   :  { %774 = vsyncadd [#allocation6], 4294964736 }
  0x33   :  { %775 = dma.done.wait [#allocation9], 128  }
  0x34   :  { %776 = vsyncadd [#allocation9], 4294967168  ;;  %v651_v0 = vld [vmem:[#allocation5 + $0x18] sm:$0xff]   ;;  %v652_v1 = vld [vmem:[#allocation5 + $0x10] sm:$0xff]   ;;  %vm121_vm0 = vcmask 523264   ;;  %s787_s2 = smov [#allocation10]  }
  0x35   :  { %578 = vmatprep.subr.bf16.mxu0 %v651_v0  ;;  %v653_v2 = vld [vmem:[#allocation5 + $0x8] sm:$0xff]   ;;  %v72_v3 = vld [vmem:[#allocation2] sm:$0xff]  ;;  %v655_v7 = vld [vmem:[#allocation7 + $0x38] sm:$0xff]   ;;  %s505_s3 = sshll.u32 %s787_s2, 4  ;;  %s506_s3 = int_to_ptr.vmem [resolvable:$true] %s505_s3 }
  0x36   :  { %579 = vmatpush3.bf16.msra.mxu0 %v651_v0  ;;  %v73_v4 = vld [vmem:[#allocation2 + $0x8] sm:$0xff]  ;;  %v654_v6 = vld [vmem:[#allocation5] sm:$0xff]   ;;  %v656_v8 = vld [vmem:[#allocation7 + $0x30] sm:$0xff]   ;;  %594 = vmatprep.subr.bf16.mxu1 %v655_v7  ;;  %s751_s11 = scalar_lea.vmem %s506_s3, 1024  ;;  %p756_p7 = scmp.lt.s32.totalorder %s506_s3, %s506_s3 }
  0x37   :  { %580 = vmatprep.subr.bf16.mxu0 %v652_v1  ;;  %v80_v5 = vpack.c.bf16 %v73_v4, %v72_v3  ;;  %v74_v9 = vld [vmem:[#allocation2 + $0x10] sm:$0xff]  ;;  %v75_v10 = vld [vmem:[#allocation2 + $0x18] sm:$0xff]  ;;  %v76_v11 = vld [vmem:[#allocation2 + $0x20] sm:$0xff]  ;;  %595 = vmatpush3.bf16.msra.mxu1 %v655_v7  ;;  %p752_p6 = scmp.ne.s32.totalorder %s506_s3, %s751_s11  ;;  %p757_p8 = scmp.lt.s32.totalorder %s751_s11, %s751_s11 }
  0x38   :  { %v77_v12 = vld [vmem:[#allocation2 + $0x28] sm:$0xff]  ;;  %596 = vmatprep.subr.bf16.mxu1 %v656_v8  ;;  %v658_v14 = vld [vmem:[#allocation7 + $0x20] sm:$0xff]   ;;  %v81_v15 = vpack.c.bf16 %v75_v10, %v74_v9  ;;  %v78_v17 = vld [vmem:[#allocation2 + $0x30] sm:$0xff] }
  0x39   :  { %586 = vmatprep.mubr.msk.bf16.mxu0 %vm121_vm0, %v80_v5  ;;  %v657_v13 = vld [vmem:[#allocation7 + $0x28] sm:$0xff]   ;;  %v82_v16 = vpack.c.bf16 %v77_v12, %v76_v11  ;;  %v79_v18 = vld [vmem:[#allocation2 + $0x38] sm:$0xff]  ;;  %v660_v21 = vld [vmem:[#allocation7 + $0x10] sm:$0xff]   ;;  %p758_p9 = por %p757_p8, %p756_p7 }
  0x3a   :  { %581 = vmatpush3.bf16.msra.mxu0 %v652_v1  ;;  %v659_v19 = vld [vmem:[#allocation7 + $0x18] sm:$0xff]   ;;  %v83_v20 = vpack.c.bf16 %v79_v18, %v78_v17  ;;  %v661_v22 = vld [vmem:[#allocation7 + $0x8] sm:$0xff]   ;;  %v662_v23 = vld [vmem:[#allocation7] sm:$0xff]  }
  0x3b   :  { %582 = vmatprep.subr.bf16.mxu0 %v653_v2  ;;  %597 = vmatpush3.bf16.msra.mxu1 %v656_v8  ;;  %v663_v24 = vld [vmem:[#allocation7 + $0x78] sm:$0xff]   ;;  %v664_v25 = vld [vmem:[#allocation7 + $0x70] sm:$0xff]   ;;  %v665_v26 = vld [vmem:[#allocation7 + $0x68] sm:$0xff]   ;;  %p759_p10 = pnand %p758_p9, %p752_p6 }
  0x3c   :  { %598 = vmatprep.subr.bf16.mxu1 %v657_v13  ;;  %v666_v27 = vld [vmem:[#allocation7 + $0x60] sm:$0xff]   ;;  %v667_v28 = vld [vmem:[#allocation7 + $0x58] sm:$0xff]   ;;  %v668_v58 = vld [vmem:[#allocation7 + $0x50] sm:$0xff]  }
  0x3d   :  { %v519_v31 = vld [vmem:[#allocation8] ss:$0 sm:$0xff]  ;;  %v669_v59 = vld [vmem:[#allocation7 + $0x48] sm:$0xff]   ;;  %v528_v63 = vld [vmem:[#allocation8 + $0x1] ss:$0 sm:$0xff] }
  0x3e   :  { %583 = vmatpush3.bf16.msra.mxu0 %v653_v2  ;;  %v670_v60 = vld [vmem:[#allocation7 + $0x40] sm:$0xff]  }
  0x3f   :  { %584 = vmatprep.subr.bf16.mxu0 %v654_v6  ;;  %599 = vmatpush3.bf16.msra.mxu1 %v657_v13 }
  0x40   :  { %600 = vmatprep.subr.bf16.mxu1 %v658_v14 }
  0x42   :  { %585 = vmatpush3.bf16.msra.mxu0 %v654_v6 }
  0x43   :  { %601 = vmatpush3.bf16.msra.mxu1 %v658_v14  ;;  %618 = vmatprep.subr.bf16.mxu0 %v663_v24 }
  0x44   :  { %602 = vmatprep.subr.bf16.mxu1 %v659_v19 }
  0x45   :  { %587 = vmatmul.mubr.msk.bf16.vlgmr.msra.gmra.mxu0 %vm121_vm0, %v81_v15 }
  0x46   :  { %590 = vmatprep.mubr.msk.bf16.mxu0 %vm121_vm0, %v82_v16  ;;  %619 = vmatpush3.bf16.msra.mxu0 %v663_v24 }
  0x47   :  { %603 = vmatpush3.bf16.msra.mxu1 %v659_v19  ;;  %620 = vmatprep.subr.bf16.mxu0 %v664_v25 }
  0x48   :  { %604 = vmatprep.subr.bf16.mxu1 %v660_v21 }
  0x4a   :  { %621 = vmatpush3.bf16.msra.mxu0 %v664_v25 }
  0x4b   :  { %605 = vmatpush3.bf16.msra.mxu1 %v660_v21  ;;  %622 = vmatprep.subr.bf16.mxu0 %v665_v26 }
  0x4c   :  { %606 = vmatprep.subr.bf16.mxu1 %v661_v22 }
  0x4d   :  { %591 = vmatmul.mubr.msk.bf16.gmra.mxu0 %vm121_vm0, %v83_v20 }
  0x4e   :  { %623 = vmatpush3.bf16.msra.mxu0 %v665_v26  ;;  %v537_v26 = vld [vmem:[#allocation8 + $0x2] ss:$0 sm:$0xff] }
  0x4f   :  { %607 = vmatpush3.bf16.msra.mxu1 %v661_v22  ;;  %624 = vmatprep.subr.bf16.mxu0 %v666_v27 }
  0x50   :  { %608 = vmatprep.subr.bf16.mxu1 %v662_v23 }
  0x52   :  { %625 = vmatpush3.bf16.msra.mxu0 %v666_v27 }
  0x53   :  { %609 = vmatpush3.bf16.msra.mxu1 %v662_v23  ;;  %626 = vmatprep.subr.bf16.mxu0 %v667_v28 }
  0x56   :  { %627 = vmatpush3.bf16.msra.mxu0 %v667_v28 }
  0x57   :  { %628 = vmatprep.subr.bf16.mxu0 %v668_v58 }
  0x5a   :  { %629 = vmatpush3.bf16.msra.mxu0 %v668_v58 }
  0x5b   :  { %630 = vmatprep.subr.bf16.mxu0 %v669_v59 }
  0x5e   :  { %631 = vmatpush3.bf16.msra.mxu0 %v669_v59 }
  0x5f   :  { %632 = vmatprep.subr.bf16.mxu0 %v670_v60 }
  0x62   :  { %633 = vmatpush3.bf16.msra.mxu0 %v670_v60 }
 0x105   :  { %v588_v29 = vpop.f32.mrf.mxu0 }
 0x106   :  { %v177_v35 = vadd.f32 %v588_v29, %v519_v31 }
 0x107   :  { %v168_v30 = vpop.f32.mrf.mxu0 }
 0x108   :  { %v169_v33 = vadd.f32 %v519_v31, %v168_v30  ;;  %v201_v42 = vmax.f32 %v177_v35, 0.0 }
 0x109   :  { %v589_v32 = vpop.f32.mrf.mxu0 }
 0x10a   :  { %v180_v34 = vadd.f32 %v589_v32, %v519_v31  ;;  %v199_v40 = vmax.f32 %v169_v33, 0.0 }
 0x10b   :  { %v171_v36 = vpop.f32.mrf.mxu0 }
 0x10c   :  { %v172_v37 = vadd.f32 %v519_v31, %v171_v36  ;;  %v202_v38 = vmax.f32 %v180_v34, 0.0 }
 0x10d   :  { %v592_v39 = vpop.f32.mrf.mxu0 }
 0x10e   :  { %v200_v41 = vmax.f32 %v172_v37, 0.0  ;;  %v208_v45 = vpack.c.bf16 %v202_v38, %v201_v42  ;;  %v193_v49 = vadd.f32 %v592_v39, %v519_v31 }
 0x10f   :  { %v184_v43 = vpop.f32.mrf.mxu0 }
 0x110   :  { %v207_v44 = vpack.c.bf16 %v200_v41, %v199_v40  ;;  %v185_v47 = vadd.f32 %v519_v31, %v184_v43  ;;  %v205_v55 = vmax.f32 %v193_v49, 0.0 }
 0x111   :  { %v593_v46 = vpop.f32.mrf.mxu0 }
 0x112   :  { %v196_v48 = vadd.f32 %v593_v46, %v519_v31  ;;  %610 = vmatprep.mubr.bf16.mxu1 %v207_v44  ;;  %v203_v53 = vmax.f32 %v185_v47, 0.0 }
 0x113   :  { %v187_v50 = vpop.f32.mrf.mxu0  ;;  %611 = vmatmul.mubr.bf16.vlgmr.msra.gmra.mxu1 %v208_v45 }
 0x114   :  { %v188_v51 = vadd.f32 %v519_v31, %v187_v50  ;;  %v206_v52 = vmax.f32 %v196_v48, 0.0 }
 0x116   :  { %v204_v54 = vmax.f32 %v188_v51, 0.0  ;;  %v210_v57 = vpack.c.bf16 %v206_v52, %v205_v55 }
 0x118   :  { %v209_v56 = vpack.c.bf16 %v204_v54, %v203_v53 }
 0x11a   :  { %614 = vmatprep.mubr.bf16.mxu1 %v209_v56 }
 0x11b   :  { %615 = vmatmul.mubr.bf16.gmra.mxu1 %v210_v57 }
 0x1d3   :  { %v612_v61 = vpop.f32.mrf.mxu1 }
 0x1d4   :  { %v323_v3 = vadd.f32 %v612_v61, %v528_v63 }
 0x1d5   :  { %v314_v62 = vpop.f32.mrf.mxu1 }
 0x1d6   :  { %v315_v1 = vadd.f32 %v528_v63, %v314_v62  ;;  %v347_v10 = vmax.f32 %v323_v3, 0.0 }
 0x1d7   :  { %v613_v0 = vpop.f32.mrf.mxu1 }
 0x1d8   :  { %v326_v2 = vadd.f32 %v613_v0, %v528_v63  ;;  %v345_v8 = vmax.f32 %v315_v1, 0.0 }
 0x1d9   :  { %v317_v4 = vpop.f32.mrf.mxu1 }
 0x1da   :  { %v318_v5 = vadd.f32 %v528_v63, %v317_v4  ;;  %v348_v6 = vmax.f32 %v326_v2, 0.0 }
 0x1db   :  { %v616_v7 = vpop.f32.mrf.mxu1 }
 0x1dc   :  { %v346_v9 = vmax.f32 %v318_v5, 0.0  ;;  %v354_v13 = vpack.c.bf16 %v348_v6, %v347_v10  ;;  %v339_v17 = vadd.f32 %v616_v7, %v528_v63 }
 0x1dd   :  { %v330_v11 = vpop.f32.mrf.mxu1 }
 0x1de   :  { %v353_v12 = vpack.c.bf16 %v346_v9, %v345_v8  ;;  %v331_v15 = vadd.f32 %v528_v63, %v330_v11  ;;  %v351_v23 = vmax.f32 %v339_v17, 0.0 }
 0x1df   :  { %v617_v14 = vpop.f32.mrf.mxu1 }
 0x1e0   :  { %v342_v16 = vadd.f32 %v617_v14, %v528_v63  ;;  %634 = vmatprep.mubr.bf16.mxu0 %v353_v12  ;;  %v349_v21 = vmax.f32 %v331_v15, 0.0 }
 0x1e1   :  { %v333_v18 = vpop.f32.mrf.mxu1  ;;  %635 = vmatmul.mubr.bf16.vlgmr.msra.gmra.mxu0 %v354_v13 }
 0x1e2   :  { %v334_v19 = vadd.f32 %v528_v63, %v333_v18  ;;  %v352_v20 = vmax.f32 %v342_v16, 0.0 }
 0x1e4   :  { %v350_v22 = vmax.f32 %v334_v19, 0.0  ;;  %v356_v25 = vpack.c.bf16 %v352_v20, %v351_v23 }
 0x1e6   :  { %v355_v24 = vpack.c.bf16 %v350_v22, %v349_v21 }
 0x1e8   :  { %638 = vmatprep.mubr.bf16.mxu0 %v355_v24 }
 0x1e9   :  { %639 = vmatmul.mubr.bf16.gmra.mxu0 %v356_v25 }
 0x2a1   :  { %v636_v27 = vpop.f32.mrf.mxu0 }
 0x2a2   :  { %v470_v28 = vadd.f32 %v636_v27, %v537_v26 }
 0x2a3   :  { %v461_v29 = vpop.f32.mrf.mxu0 }
 0x2a4   :  { %494 = vst [vmem:[#allocation10 + $0x10] sm:$0xff] %v470_v28  ;;  %v462_v30 = vadd.f32 %v537_v26, %v461_v29 }
 0x2a5   :  { %v637_v31 = vpop.f32.mrf.mxu0 }
 0x2a6   :  { %492 = vst [vmem:[#allocation10] sm:$0xff] %v462_v30  ;;  %v473_v32 = vadd.f32 %v637_v31, %v537_v26 }
 0x2a7   :  { %v464_v33 = vpop.f32.mrf.mxu0 }
 0x2a8   :  { %495 = vst [vmem:[#allocation10 + $0x18] sm:$0xff] %v473_v32  ;;  %v465_v34 = vadd.f32 %v537_v26, %v464_v33 }
 0x2a9   :  { %v640_v35 = vpop.f32.mrf.mxu0 }
 0x2aa   :  { %493 = vst [vmem:[#allocation10 + $0x8] sm:$0xff] %v465_v34  ;;  %v486_v36 = vadd.f32 %v640_v35, %v537_v26 }
 0x2ab   :  { %v477_v37 = vpop.f32.mrf.mxu0 }
 0x2ac   :  { %498 = vst [vmem:[#allocation10 + $0x30] sm:$0xff] %v486_v36  ;;  %v478_v38 = vadd.f32 %v537_v26, %v477_v37 }
 0x2ad   :  { %v641_v39 = vpop.f32.mrf.mxu0 }
 0x2ae   :  { %496 = vst [vmem:[#allocation10 + $0x20] sm:$0xff] %v478_v38  ;;  %v489_v40 = vadd.f32 %v641_v39, %v537_v26 }
 0x2af   :  { %v480_v41 = vpop.f32.mrf.mxu0 }
 0x2b0   :  { %499 = vst [vmem:[#allocation10 + $0x38] sm:$0xff] %v489_v40  ;;  %v481_v42 = vadd.f32 %v537_v26, %v480_v41 }
 0x2b2   :  { %497 = vst [vmem:[#allocation10 + $0x28] sm:$0xff] %v481_v42 }
 0x2b3   :  { %762 = shalt.err (!%p759_p10)
}
 0x2b4   :  { %511 = dma.vmem_to_hbm [thread:$0]  %s506_s3, 1024, %s848_s4, [#allocation4], %s783_s25, %s783_s25, %s784_s26  }
 0x2b5   :  { %777 = dma.done.wait [#allocation4], 1024  }
 0x2b6   :  { %778 = vsyncadd [#allocation4], 4294966272 }
 0x2b7   :  { %515 = vsyncpa [#allocation3], 1 }
 0x2b8   :  { %516 = vsyncpa [#allocation6], 1 }
 0x2b9   :  { %517 = vsyncpa [#allocation9], 1 }
 0x2ba   :  { %518 = vsyncpa [#allocation4], 1 }

// kernel: tpu_custom_call.1
= control target key start
LH: loop header
LB: loop body
LE: loop exit
PB: predicated region body
PF: predicated region fallthrough
CT: control target
= control target key end

     0   :  { %9 = vsyncpa [#allocation3], 0  ;;  %s844_s0 = inlined_call_operand.hbm [shape: f32[64,64], index: 0, kind: input, shape index: {}]   ;;  %s845_s1 = inlined_call_operand.hbm [shape: bf16[64,128], index: 1, kind: input, shape index: {}]   ;;  %s846_s2 = inlined_call_operand.hbm [shape: bf16[2,128,128], index: 2, kind: input, shape index: {}]   ;;  %s847_s3 = inlined_call_operand.hbm [shape: f32[5,128], index: 3, kind: input, shape index: {}]   ;;  %s848_s4 = inlined_call_operand.hbm [shape: f32[64,128], index: 4, kind: output, shape index: {}]  }
   0x1   :  { %10 = vsyncpa [#allocation6], 0 }
   0x2   :  { %11 = vsyncpa [#allocation9], 0 }
   0x3   :  { %12 = vsyncpa [#allocation4], 0  ;;  %s779_s15 = smov [#allocation5]  }
   0x4   :  { %s30_s16 = sshll.u32 %s779_s15, 4  ;;  %s31_s16 = int_to_ptr.vmem [resolvable:$true] %s30_s16 }
   0x5   :  { %s679_s17 = scalar_lea.vmem %s31_s16, 512  ;;  %p684_p1 = scmp.lt.s32.totalorder %s31_s16, %s31_s16 }
   0x6   :  { %p680_p0 = scmp.ne.s32.totalorder %s31_s16, %s679_s17  ;;  %p685_p2 = scmp.lt.s32.totalorder %s679_s17, %s679_s17 }
   0x8   :  { %p686_p3 = por %p685_p2, %p684_p1 }
   0xa   :  { %p687_p4 = pnand %p686_p3, %p680_p0 }
   0xc   :  { %690 = shalt.err (!%p687_p4)
}
   0xd   :  { %s780_s18 = smov 64   ;;  %s781_s19 = smov 4  }
   0xe   :  { %36 = dma.hbm_to_vmem [thread:$0]  %s845_s1, 512, %s31_s16, [#allocation6], %s780_s18, %s780_s18, %s781_s19  }
   0xf   :  { %s782_s22 = smov [#allocation2]  }
  0x10   :  { %s18_s23 = sshll.u32 %s782_s22, 4  ;;  %s19_s23 = int_to_ptr.vmem [resolvable:$true] %s18_s23 }
  0x11   :  { %s699_s24 = scalar_lea.vmem %s19_s23, 1024  ;;  %p704_p6 = scmp.lt.s32.totalorder %s19_s23, %s19_s23 }
  0x12   :  { %p700_p5 = scmp.ne.s32.totalorder %s19_s23, %s699_s24  ;;  %p705_p7 = scmp.lt.s32.totalorder %s699_s24, %s699_s24 }
  0x14   :  { %p706_p8 = por %p705_p7, %p704_p6 }
  0x16   :  { %p707_p9 = pnand %p706_p8, %p700_p5 }
  0x18   :  { %710 = shalt.err (!%p707_p9)
}
  0x19   :  { %s783_s25 = smov 128   ;;  %s784_s26 = smov 8  }
  0x1a   :  { %24 = dma.hbm_to_vmem [thread:$0]  %s844_s0, 1024, %s19_s23, [#allocation3], %s783_s25, %s783_s25, %s784_s26  }
  0x1b   :  { %s785_s1 = smov [#allocation7]   ;;  %s786_s30 = smov [#allocation8]  }
  0x1c   :  { %s42_s29 = sshll.u32 %s785_s1, 4  ;;  %s55_s5 = sshll.u32 %s786_s30, 4  ;;  %s43_s29 = int_to_ptr.vmem [resolvable:$true] %s42_s29  ;;  %s56_s5 = int_to_ptr.vmem [resolvable:$true] %s55_s5 }
  0x1d   :  { %s719_s6 = scalar_lea.vmem %s43_s29, 2048  ;;  %p724_p11 = scmp.lt.s32.totalorder %s43_s29, %s43_s29 }
  0x1e   :  { %p720_p10 = scmp.ne.s32.totalorder %s43_s29, %s719_s6  ;;  %p725_p12 = scmp.lt.s32.totalorder %s719_s6, %s719_s6 }
  0x20   :  { %p726_p13 = por %p725_p12, %p724_p11 }
  0x22   :  { %p727_p0 = pnand %p726_p13, %p720_p10 }
  0x24   :  { %730 = shalt.err (!%p727_p0)
}
  0x25   :  { %48 = dma.hbm_to_vmem [thread:$0]  %s846_s2, 2048, %s43_s29, [#allocation6], %s780_s18, %s780_s18, %s781_s19  }
  0x26   :  { %s739_s0 = scalar_lea.vmem %s56_s5, 128  ;;  %p744_p2 = scmp.lt.s32.totalorder %s56_s5, %s56_s5 }
  0x27   :  { %p740_p1 = scmp.ne.s32.totalorder %s56_s5, %s739_s0  ;;  %p745_p3 = scmp.lt.s32.totalorder %s739_s0, %s739_s0 }
  0x29   :  { %p746_p4 = por %p745_p3, %p744_p2 }
  0x2b   :  { %p747_p5 = pnand %p746_p4, %p740_p1 }
  0x2d   :  { %750 = shalt.err (!%p747_p5)
}
  0x2e   :  { %58 = dma.hbm_to_vmem [thread:$0]  %s847_s3, 128, %s56_s5, [#allocation9]  }
  0x2f   :  { %771 = dma.done.wait [#allocation3], 1024  }
  0x30   :  { %772 = vsyncadd [#allocation3], 4294966272 }
  0x31   :  { %773 = dma.done.wait [#allocation6], 2560  }
  0x32   :  { %774 = vsyncadd [#allocation6], 4294964736 }
  0x33   :  { %775 = dma.done.wait [#allocation9], 128  }
  0x34   :  { %776 = vsyncadd [#allocation9], 4294967168  ;;  %v651_v0 = vld [vmem:[#allocation5 + $0x18] sm:$0xff]   ;;  %v652_v1 = vld [vmem:[#allocation5 + $0x10] sm:$0xff]   ;;  %vm121_vm0 = vcmask 523264   ;;  %s787_s2 = smov [#allocation10]  }
  0x35   :  { %578 = vmatprep.subr.bf16.mxu0 %v651_v0  ;;  %v653_v2 = vld [vmem:[#allocation5 + $0x8] sm:$0xff]   ;;  %v72_v3 = vld [vmem:[#allocation2] sm:$0xff]  ;;  %v655_v7 = vld [vmem:[#allocation7 + $0x38] sm:$0xff]   ;;  %s505_s3 = sshll.u32 %s787_s2, 4  ;;  %s506_s3 = int_to_ptr.vmem [resolvable:$true] %s505_s3 }
  0x36   :  { %579 = vmatpush3.bf16.msra.mxu0 %v651_v0  ;;  %v73_v4 = vld [vmem:[#allocation2 + $0x8] sm:$0xff]  ;;  %v654_v6 = vld [vmem:[#allocation5] sm:$0xff]   ;;  %v656_v8 = vld [vmem:[#allocation7 + $0x30] sm:$0xff]   ;;  %594 = vmatprep.subr.bf16.mxu1 %v655_v7  ;;  %s751_s11 = scalar_lea.vmem %s506_s3, 1024  ;;  %p756_p7 = scmp.lt.s32.totalorder %s506_s3, %s506_s3 }
  0x37   :  { %580 = vmatprep.subr.bf16.mxu0 %v652_v1  ;;  %v80_v5 = vpack.c.bf16 %v73_v4, %v72_v3  ;;  %v74_v9 = vld [vmem:[#allocation2 + $0x10] sm:$0xff]  ;;  %v75_v10 = vld [vmem:[#allocation2 + $0x18] sm:$0xff]  ;;  %v76_v11 = vld [vmem:[#allocation2 + $0x20] sm:$0xff]  ;;  %595 = vmatpush3.bf16.msra.mxu1 %v655_v7  ;;  %p752_p6 = scmp.ne.s32.totalorder %s506_s3, %s751_s11  ;;  %p757_p8 = scmp.lt.s32.totalorder %s751_s11, %s751_s11 }
  0x38   :  { %v77_v12 = vld [vmem:[#allocation2 + $0x28] sm:$0xff]  ;;  %596 = vmatprep.subr.bf16.mxu1 %v656_v8  ;;  %v658_v14 = vld [vmem:[#allocation7 + $0x20] sm:$0xff]   ;;  %v81_v15 = vpack.c.bf16 %v75_v10, %v74_v9  ;;  %v78_v17 = vld [vmem:[#allocation2 + $0x30] sm:$0xff] }
  0x39   :  { %586 = vmatprep.mubr.msk.bf16.mxu0 %vm121_vm0, %v80_v5  ;;  %v657_v13 = vld [vmem:[#allocation7 + $0x28] sm:$0xff]   ;;  %v82_v16 = vpack.c.bf16 %v77_v12, %v76_v11  ;;  %v79_v18 = vld [vmem:[#allocation2 + $0x38] sm:$0xff]  ;;  %v660_v21 = vld [vmem:[#allocation7 + $0x10] sm:$0xff]   ;;  %p758_p9 = por %p757_p8, %p756_p7 }
  0x3a   :  { %581 = vmatpush3.bf16.msra.mxu0 %v652_v1  ;;  %v659_v19 = vld [vmem:[#allocation7 + $0x18] sm:$0xff]   ;;  %v83_v20 = vpack.c.bf16 %v79_v18, %v78_v17  ;;  %v661_v22 = vld [vmem:[#allocation7 + $0x8] sm:$0xff]   ;;  %v662_v23 = vld [vmem:[#allocation7] sm:$0xff]  }
  0x3b   :  { %582 = vmatprep.subr.bf16.mxu0 %v653_v2  ;;  %597 = vmatpush3.bf16.msra.mxu1 %v656_v8  ;;  %v663_v24 = vld [vmem:[#allocation7 + $0x78] sm:$0xff]   ;;  %v664_v25 = vld [vmem:[#allocation7 + $0x70] sm:$0xff]   ;;  %v665_v26 = vld [vmem:[#allocation7 + $0x68] sm:$0xff]   ;;  %p759_p10 = pnand %p758_p9, %p752_p6 }
  0x3c   :  { %598 = vmatprep.subr.bf16.mxu1 %v657_v13  ;;  %v666_v27 = vld [vmem:[#allocation7 + $0x60] sm:$0xff]   ;;  %v667_v28 = vld [vmem:[#allocation7 + $0x58] sm:$0xff]   ;;  %v668_v58 = vld [vmem:[#allocation7 + $0x50] sm:$0xff]  }
  0x3d   :  { %v519_v31 = vld [vmem:[#allocation8] ss:$0 sm:$0xff]  ;;  %v669_v59 = vld [vmem:[#allocation7 + $0x48] sm:$0xff]   ;;  %v528_v63 = vld [vmem:[#allocation8 + $0x1] ss:$0 sm:$0xff] }
  0x3e   :  { %583 = vmatpush3.bf16.msra.mxu0 %v653_v2  ;;  %v670_v60 = vld [vmem:[#allocation7 + $0x40] sm:$0xff]  }
  0x3f   :  { %584 = vmatprep.subr.bf16.mxu0 %v654_v6  ;;  %599 = vmatpush3.bf16.msra.mxu1 %v657_v13 }
  0x40   :  { %600 = vmatprep.subr.bf16.mxu1 %v658_v14 }
  0x42   :  { %585 = vmatpush3.bf16.msra.mxu0 %v654_v6 }
  0x43   :  { %601 = vmatpush3.bf16.msra.mxu1 %v658_v14  ;;  %618 = vmatprep.subr.bf16.mxu0 %v663_v24 }
  0x44   :  { %602 = vmatprep.subr.bf16.mxu1 %v659_v19 }
  0x45   :  { %587 = vmatmul.mubr.msk.bf16.vlgmr.msra.gmra.mxu0 %vm121_vm0, %v81_v15 }
  0x46   :  { %590 = vmatprep.mubr.msk.bf16.mxu0 %vm121_vm0, %v82_v16  ;;  %619 = vmatpush3.bf16.msra.mxu0 %v663_v24 }
  0x47   :  { %603 = vmatpush3.bf16.msra.mxu1 %v659_v19  ;;  %620 = vmatprep.subr.bf16.mxu0 %v664_v25 }
  0x48   :  { %604 = vmatprep.subr.bf16.mxu1 %v660_v21 }
  0x4a   :  { %621 = vmatpush3.bf16.msra.mxu0 %v664_v25 }
  0x4b   :  { %605 = vmatpush3.bf16.msra.mxu1 %v660_v21  ;;  %622 = vmatprep.subr.bf16.mxu0 %v665_v26 }
  0x4c   :  { %606 = vmatprep.subr.bf16.mxu1 %v661_v22 }
  0x4d   :  { %591 = vmatmul.mubr.msk.bf16.gmra.mxu0 %vm121_vm0, %v83_v20 }
  0x4e   :  { %623 = vmatpush3.bf16.msra.mxu0 %v665_v26  ;;  %v537_v26 = vld [vmem:[#allocation8 + $0x2] ss:$0 sm:$0xff] }
  0x4f   :  { %607 = vmatpush3.bf16.msra.mxu1 %v661_v22  ;;  %624 = vmatprep.subr.bf16.mxu0 %v666_v27 }
  0x50   :  { %608 = vmatprep.subr.bf16.mxu1 %v662_v23 }
  0x52   :  { %625 = vmatpush3.bf16.msra.mxu0 %v666_v27 }
  0x53   :  { %609 = vmatpush3.bf16.msra.mxu1 %v662_v23  ;;  %626 = vmatprep.subr.bf16.mxu0 %v667_v28 }
  0x56   :  { %627 = vmatpush3.bf16.msra.mxu0 %v667_v28 }
  0x57   :  { %628 = vmatprep.subr.bf16.mxu0 %v668_v58 }
  0x5a   :  { %629 = vmatpush3.bf16.msra.mxu0 %v668_v58 }
  0x5b   :  { %630 = vmatprep.subr.bf16.mxu0 %v669_v59 }
  0x5e   :  { %631 = vmatpush3.bf16.msra.mxu0 %v669_v59 }
  0x5f   :  { %632 = vmatprep.subr.bf16.mxu0 %v670_v60 }
  0x62   :  { %633 = vmatpush3.bf16.msra.mxu0 %v670_v60 }
 0x105   :  { %v588_v29 = vpop.f32.mrf.mxu0 }
 0x106   :  { %v177_v35 = vadd.f32 %v588_v29, %v519_v31 }
 0x107   :  { %v168_v30 = vpop.f32.mrf.mxu0 }
 0x108   :  { %v169_v33 = vadd.f32 %v519_v31, %v168_v30  ;;  %v201_v42 = vmax.f32 %v177_v35, 0.0 }
 0x109   :  { %v589_v32 = vpop.f32.mrf.mxu0 }
 0x10a   :  { %v180_v34 = vadd.f32 %v589_v32, %v519_v31  ;;  %v199_v40 = vmax.f32 %v169_v33, 0.0 }
 0x10b   :  { %v171_v36 = vpop.f32.mrf.mxu0 }
 0x10c   :  { %v172_v37 = vadd.f32 %v519_v31, %v171_v36  ;;  %v202_v38 = vmax.f32 %v180_v34, 0.0 }
 0x10d   :  { %v592_v39 = vpop.f32.mrf.mxu0 }
 0x10e   :  { %v200_v41 = vmax.f32 %v172_v37, 0.0  ;;  %v208_v45 = vpack.c.bf16 %v202_v38, %v201_v42  ;;  %v193_v49 = vadd.f32 %v592_v39, %v519_v31 }
 0x10f   :  { %v184_v43 = vpop.f32.mrf.mxu0 }
 0x110   :  { %v207_v44 = vpack.c.bf16 %v200_v41, %v199_v40  ;;  %v185_v47 = vadd.f32 %v519_v31, %v184_v43  ;;  %v205_v55 = vmax.f32 %v193_v49, 0.0 }
 0x111   :  { %v593_v46 = vpop.f32.mrf.mxu0 }
 0x112   :  { %v196_v48 = vadd.f32 %v593_v46, %v519_v31  ;;  %610 = vmatprep.mubr.bf16.mxu1 %v207_v44  ;;  %v203_v53 = vmax.f32 %v185_v47, 0.0 }
 0x113   :  { %v187_v50 = vpop.f32.mrf.mxu0  ;;  %611 = vmatmul.mubr.bf16.vlgmr.msra.gmra.mxu1 %v208_v45 }
 0x114   :  { %v188_v51 = vadd.f32 %v519_v31, %v187_v50  ;;  %v206_v52 = vmax.f32 %v196_v48, 0.0 }
 0x116   :  { %v204_v54 = vmax.f32 %v188_v51, 0.0  ;;  %v210_v57 = vpack.c.bf16 %v206_v52, %v205_v55 }
 0x118   :  { %v209_v56 = vpack.c.bf16 %v204_v54, %v203_v53 }
 0x11a   :  { %614 = vmatprep.mubr.bf16.mxu1 %v209_v56 }
 0x11b   :  { %615 = vmatmul.mubr.bf16.gmra.mxu1 %v210_v57 }
 0x1d3   :  { %v612_v61 = vpop.f32.mrf.mxu1 }
 0x1d4   :  { %v323_v3 = vadd.f32 %v612_v61, %v528_v63 }
 0x1d5   :  { %v314_v62 = vpop.f32.mrf.mxu1 }
 0x1d6   :  { %v315_v1 = vadd.f32 %v528_v63, %v314_v62  ;;  %v347_v10 = vmax.f32 %v323_v3, 0.0 }
 0x1d7   :  { %v613_v0 = vpop.f32.mrf.mxu1 }
 0x1d8   :  { %v326_v2 = vadd.f32 %v613_v0, %v528_v63  ;;  %v345_v8 = vmax.f32 %v315_v1, 0.0 }
 0x1d9   :  { %v317_v4 = vpop.f32.mrf.mxu1 }
 0x1da   :  { %v318_v5 = vadd.f32 %v528_v63, %v317_v4  ;;  %v348_v6 = vmax.f32 %v326_v2, 0.0 }
 0x1db   :  { %v616_v7 = vpop.f32.mrf.mxu1 }
 0x1dc   :  { %v346_v9 = vmax.f32 %v318_v5, 0.0  ;;  %v354_v13 = vpack.c.bf16 %v348_v6, %v347_v10  ;;  %v339_v17 = vadd.f32 %v616_v7, %v528_v63 }
 0x1dd   :  { %v330_v11 = vpop.f32.mrf.mxu1 }
 0x1de   :  { %v353_v12 = vpack.c.bf16 %v346_v9, %v345_v8  ;;  %v331_v15 = vadd.f32 %v528_v63, %v330_v11  ;;  %v351_v23 = vmax.f32 %v339_v17, 0.0 }
 0x1df   :  { %v617_v14 = vpop.f32.mrf.mxu1 }
 0x1e0   :  { %v342_v16 = vadd.f32 %v617_v14, %v528_v63  ;;  %634 = vmatprep.mubr.bf16.mxu0 %v353_v12  ;;  %v349_v21 = vmax.f32 %v331_v15, 0.0 }
 0x1e1   :  { %v333_v18 = vpop.f32.mrf.mxu1  ;;  %635 = vmatmul.mubr.bf16.vlgmr.msra.gmra.mxu0 %v354_v13 }
 0x1e2   :  { %v334_v19 = vadd.f32 %v528_v63, %v333_v18  ;;  %v352_v20 = vmax.f32 %v342_v16, 0.0 }
 0x1e4   :  { %v350_v22 = vmax.f32 %v334_v19, 0.0  ;;  %v356_v25 = vpack.c.bf16 %v352_v20, %v351_v23 }
 0x1e6   :  { %v355_v24 = vpack.c.bf16 %v350_v22, %v349_v21 }
 0x1e8   :  { %638 = vmatprep.mubr.bf16.mxu0 %v355_v24 }
 0x1e9   :  { %639 = vmatmul.mubr.bf16.gmra.mxu0 %v356_v25 }
 0x2a1   :  { %v636_v27 = vpop.f32.mrf.mxu0 }
 0x2a2   :  { %v470_v28 = vadd.f32 %v636_v27, %v537_v26 }
 0x2a3   :  { %v461_v29 = vpop.f32.mrf.mxu0 }
 0x2a4   :  { %494 = vst [vmem:[#allocation10 + $0x10] sm:$0xff] %v470_v28  ;;  %v462_v30 = vadd.f32 %v537_v26, %v461_v29 }
 0x2a5   :  { %v637_v31 = vpop.f32.mrf.mxu0 }
 0x2a6   :  { %492 = vst [vmem:[#allocation10] sm:$0xff] %v462_v30  ;;  %v473_v32 = vadd.f32 %v637_v31, %v537_v26 }
 0x2a7   :  { %v464_v33 = vpop.f32.mrf.mxu0 }
 0x2a8   :  { %495 = vst [vmem:[#allocation10 + $0x18] sm:$0xff] %v473_v32  ;;  %v465_v34 = vadd.f32 %v537_v26, %v464_v33 }
 0x2a9   :  { %v640_v35 = vpop.f32.mrf.mxu0 }
 0x2aa   :  { %493 = vst [vmem:[#allocation10 + $0x8] sm:$0xff] %v465_v34  ;;  %v486_v36 = vadd.f32 %v640_v35, %v537_v26 }
 0x2ab   :  { %v477_v37 = vpop.f32.mrf.mxu0 }
 0x2ac   :  { %498 = vst [vmem:[#allocation10 + $0x30] sm:$0xff] %v486_v36  ;;  %v478_v38 = vadd.f32 %v537_v26, %v477_v37 }
 0x2ad   :  { %v641_v39 = vpop.f32.mrf.mxu0 }
 0x2ae   :  { %496 = vst [vmem:[#allocation10 + $0x20] sm:$0xff] %v478_v38  ;;  %v489_v40 = vadd.f32 %v641_v39, %v537_v26 }
 0x2af   :  { %v480_v41 = vpop.f32.mrf.mxu0 }
 0x2b0   :  { %499 = vst [vmem:[#allocation10 + $0x38] sm:$0xff] %v489_v40  ;;  %v481_v42 = vadd.f32 %v537_v26, %v480_v41 }
 0x2b2   :  { %497 = vst [vmem:[#allocation10 + $0x28] sm:$0xff] %v481_v42 }
 0x2b3   :  { %762 = shalt.err (!%p759_p10)
}
 0x2b4   :  { %511 = dma.vmem_to_hbm [thread:$0]  %s506_s3, 1024, %s848_s4, [#allocation4], %s783_s25, %s783_s25, %s784_s26  }
 0x2b5   :  { %777 = dma.done.wait [#allocation4], 1024  }
 0x2b6   :  { %778 = vsyncadd [#allocation4], 4294966272 }
 0x2b7   :  { %515 = vsyncpa [#allocation3], 1 }
 0x2b8   :  { %516 = vsyncpa [#allocation6], 1 }
 0x2b9   :  { %517 = vsyncpa [#allocation9], 1 }
 0x2ba   :  { %518 = vsyncpa [#allocation4], 1 }

</bundles_post_ra>
